<compile_context>
chip_gen: v6e
topology: v6e:2x2x1
jax: 0.10.0
libtpu: 0.0.40
codegen_flags: <defaults>
</compile_context>

<pallas_src>
import functools

import jax
import jax.numpy as jnp
from jax.experimental import pallas as pl
from jax.experimental.pallas import tpu as pltpu

# (in_features, out_features) of fc1..fc4 in the PyTorch module.
_LAYER_DIMS = ((5, 10), (10, 10), (10, 10), (10, 3))
_N_LAYERS = len(_LAYER_DIMS)
_IN_FEATURES = _LAYER_DIMS[0][0]
_OUT_FEATURES = _LAYER_DIMS[-1][1]

_IN_PAD = 8      # x feature rows (sublanes): 5 -> 8
_K_PAD = 16      # padded contraction dim for every layer
_N_PAD = 16      # padded output-feature dim (hidden layers have 10 features)
_OUT_PAD = 8     # output slab rows (sublanes): 3 -> 8
_LANES = 128     # batch (lane) padding granularity
_STRIP = 512     # batch lanes processed per inner strip


def mlp_kernel(x_ref, w_ref, b_ref, o_ref):
    # x_ref: (8, tb)        input tile: features on sublanes, batch on lanes
    # w_ref: (4, 16, 16)    W^T slabs (out, in), zero-padded; grid-resident
    # b_ref: (4, 16, 1)     bias slabs, zero-padded; grid-resident
    # o_ref: (8, tb)        output tile (only sublanes 0..2 meaningful)
    w = w_ref[...]
    b = b_ref[...]
    tb = x_ref.shape[1]

    # Static strip loop (trip count <= block_b/_STRIP): bounds vreg live range while the
    # HBM DMA tile stays tb lanes wide; all offsets are Python ints (aligned slices).
    col = 0
    while col < tb:
        sw = min(_STRIP, tb - col)
        x_s = x_ref[:, col:col + sw]                                       # (8, sw)
        # Pad features 8 -> 16 on sublanes so every layer uses the same (16,16)@(16,sw) dot.
        h = jnp.concatenate(
            [x_s, jnp.zeros((_K_PAD - _IN_PAD, sw), x_s.dtype)], axis=0)  # (16, sw)
        for i in range(_N_LAYERS):
            acc = jnp.dot(w[i], h,
                          preferred_element_type=jnp.float32,
                          precision=jax.lax.Precision.HIGHEST) + b[i]      # (16, sw)
            h = acc if i == _N_LAYERS - 1 else jnp.maximum(acc, 0.0)
        o_ref[:, col:col + sw] = h[:_OUT_PAD, :].astype(o_ref.dtype)
        col += sw


def _round_up(n, m):
    return ((n + m - 1) // m) * m


def _cdiv(a, b):
    return -(-a // b)


def _choose_tiles(B, block_b):
    """Returns (tb, b_pad): lane tile size and padded batch, both multiples of 128."""
    block_b = max(_round_up(block_b, _LANES), _LANES)
    b_min = _round_up(max(B, 1), _LANES)
    # >= 2 grid steps when there is enough work (keeps both v7x TensorCores busy) and
    # enough steps that each tile is <= block_b; waste is < 128 lanes per block.
    min_blocks = 2 if b_min >= 2 * _STRIP else 1
    n_blocks = max(_cdiv(b_min, block_b), min_blocks)
    tb = _round_up(_cdiv(b_min, n_blocks), _LANES)
    n_blocks = _cdiv(b_min, tb)
    return tb, n_blocks * tb


def pack_params(params):
    """Pack the 4 weights/biases into two zero-padded slabs in the transposed layout."""
    w_slab = jnp.zeros((_N_LAYERS, _N_PAD, _K_PAD), jnp.float32)
    b_slab = jnp.zeros((_N_LAYERS, _N_PAD, 1), jnp.float32)
    for i, (k, n) in enumerate(_LAYER_DIMS):
        # Kernel computes W^T @ h, so the slab stores (out, in) == the PyTorch layout.
        w_slab = w_slab.at[i, :n, :k].set(params[f"w{i + 1}"].T)
        b_slab = b_slab.at[i, :n, 0].set(params[f"b{i + 1}"].reshape(-1))
    return w_slab, b_slab


@functools.partial(jax.jit, static_argnames=("block_b",))
def model_v1_forward(x, w_slab, b_slab, *, block_b=2048):
    """x: (B, 5) f32. Returns (B, 3) f32 == fc4(relu(fc3(relu(fc2(relu(fc1(x)))))))."""
    B = x.shape[0]
    tb, b_pad = _choose_tiles(B, block_b)

    # Single fused pad+transpose: batch on lanes, features on sublanes.
    x_t = jnp.pad(x.astype(jnp.float32).T,
                  ((0, _IN_PAD - _IN_FEATURES), (0, b_pad - B)))           # (8, b_pad)

    flops = 2 * B * sum(k * n for k, n in _LAYER_DIMS)
    bytes_accessed = (x_t.size + w_slab.size + b_slab.size + _OUT_PAD * b_pad) * 4

    out = pl.pallas_call(
        mlp_kernel,
        out_shape=jax.ShapeDtypeStruct((_OUT_PAD, b_pad), jnp.float32),
        grid=(b_pad // tb,),
        in_specs=[
            pl.BlockSpec((_IN_PAD, tb), lambda i: (0, i)),
            pl.BlockSpec((_N_LAYERS, _N_PAD, _K_PAD), lambda i: (0, 0, 0)),
            pl.BlockSpec((_N_LAYERS, _N_PAD, 1), lambda i: (0, 0, 0)),
        ],
        out_specs=pl.BlockSpec((_OUT_PAD, tb), lambda i: (0, i)),
        compiler_params=pltpu.CompilerParams(
            dimension_semantics=("parallel",)),
        cost_estimate=pl.CostEstimate(
            flops=flops, transcendentals=0, bytes_accessed=bytes_accessed),
    )(x_t, w_slab, b_slab)

    return out[:_OUT_FEATURES, :B].T


def init_params(key):
    """Deterministic init mirroring nn.Linear shapes (weights stored (in, out))."""
    params = {}
    for i, (fan_in, fan_out) in enumerate(_LAYER_DIMS, start=1):
        key, kw, kb = jax.random.split(key, 3)
        bound = 1.0 / jnp.sqrt(fan_in)
        params[f"w{i}"] = jax.random.uniform(
            kw, (fan_in, fan_out), jnp.float32, -bound, bound)
        params[f"b{i}"] = jax.random.uniform(
            kb, (1, fan_out), jnp.float32, -bound, bound)
    return params


def reference_forward(x, params):
    h = x
    for i in range(1, _N_LAYERS):
        h = jnp.maximum(
            jnp.dot(h, params[f"w{i}"], precision=jax.lax.Precision.HIGHEST)
            + params[f"b{i}"], 0.0)
    return (jnp.dot(h, params[f"w{_N_LAYERS}"], precision=jax.lax.Precision.HIGHEST)
            + params[f"b{_N_LAYERS}"])


if __name__ == "__main__":
    key = jax.random.PRNGKey(0)
    key, kx = jax.random.split(key)
    params = init_params(key)
    w_slab, b_slab = pack_params(params)

    # Small primary check.
    B = 8
    x = jax.random.normal(kx, (B, _IN_FEATURES), jnp.float32)
    out = jax.block_until_ready(model_v1_forward(x, w_slab, b_slab))
    ref = reference_forward(x, params)
    assert out.shape == (B, _OUT_FEATURES), out.shape
    assert jnp.allclose(out, ref, atol=1e-5, rtol=1e-4), "mismatch vs reference (B=8)"

    # Exercise the multi-tile grid + in-kernel strip + batch-tail padding path.
    key, kx2 = jax.random.split(key)
    B2 = 1200
    x2 = jax.random.normal(kx2, (B2, _IN_FEATURES), jnp.float32)
    out2 = jax.block_until_ready(model_v1_forward(x2, w_slab, b_slab))
    ref2 = reference_forward(x2, params)
    assert out2.shape == (B2, _OUT_FEATURES), out2.shape
    assert jnp.allclose(out2, ref2, atol=1e-5, rtol=1e-4), "mismatch vs reference (B=1200)"

    print("KERNEL_OK")
</pallas_src>

<mosaic_0001>
module attributes {stable_mosaic.version = 11 : i64} {
  func.func @mlp_kernel(%arg0: i32, %arg1: memref<8x128xf32, #tpu.memory_space<vmem>>, %arg2: memref<4x16x16xf32, #tpu.memory_space<vmem>>, %arg3: memref<4x16x1xf32, #tpu.memory_space<vmem>>, %arg4: memref<8x128xf32, #tpu.memory_space<vmem>>) attributes {dimension_semantics = [#tpu.dimension_semantics<parallel>], iteration_bounds = array<i64: 1>, scalar_prefetch = 0 : i64, scratch_operands = 0 : i64, tpu.core_type = #tpu.core_type<tc>, window_params = [{transform_indices = @transform_0, window_bounds = array<i64: 8, 128>}, {pipeline_mode = #tpu.pipeline_mode<synchronous>, transform_indices = @transform_1, window_bounds = array<i64: 4, 16, 16>}, {pipeline_mode = #tpu.pipeline_mode<synchronous>, transform_indices = @transform_2, window_bounds = array<i64: 4, 16, 1>}, {transform_indices = @transform_3, window_bounds = array<i64: 8, 128>}]} {
    %c0 = arith.constant 0 : index
    %c0_0 = arith.constant 0 : index
    %c0_1 = arith.constant 0 : index
    %0 = vector.load %arg2[%c0, %c0_0, %c0_1] : memref<4x16x16xf32, #tpu.memory_space<vmem>>, vector<4x16x16xf32>
    %c0_2 = arith.constant 0 : index
    %c0_3 = arith.constant 0 : index
    %c0_4 = arith.constant 0 : index
    %1 = vector.load %arg3[%c0_2, %c0_3, %c0_4] : memref<4x16x1xf32, #tpu.memory_space<vmem>>, vector<4x16x1xf32>
    %c0_5 = arith.constant 0 : index
    %c0_6 = arith.constant 0 : index
    %2 = vector.load %arg1[%c0_5, %c0_6] : memref<8x128xf32, #tpu.memory_space<vmem>>, vector<8x128xf32>
    %cst = arith.constant 0.000000e+00 : f32
    %3 = vector.broadcast %cst : f32 to vector<8x128xf32>
    %4 = tpu.concatenate %2, %3 in 0 : vector<8x128xf32>, vector<8x128xf32> -> vector<16x128xf32>
    %5 = vector.extract_strided_slice %0 {offsets = [0, 0, 0], sizes = [1, 16, 16], strides = [1, 1, 1]} : vector<4x16x16xf32> to vector<1x16x16xf32>
    %6 = vector.shape_cast %5 : vector<1x16x16xf32> to vector<16x16xf32>
    %cst_7 = arith.constant dense<0.000000e+00> : vector<16x128xf32>
    %7 = tpu.matmul %6, %4, %cst_7 {dimension_numbers = #tpu.dot_dimension_numbers<[1], [0], [0], [1], [0, 0, 1, 1], [], []>, precision = #tpu.contract_precision<fp32>} : vector<16x16xf32>, vector<16x128xf32>, vector<16x128xf32> -> vector<16x128xf32>
    %8 = vector.extract_strided_slice %1 {offsets = [0, 0, 0], sizes = [1, 16, 1], strides = [1, 1, 1]} : vector<4x16x1xf32> to vector<1x16x1xf32>
    %9 = vector.shape_cast %8 : vector<1x16x1xf32> to vector<16x1xf32>
    %10 = vector.broadcast %9 : vector<16x1xf32> to vector<16x128xf32>
    %11 = arith.addf %7, %10 : vector<16x128xf32>
    %cst_8 = arith.constant 0.000000e+00 : f32
    %12 = vector.broadcast %cst_8 : f32 to vector<16x128xf32>
    %13 = arith.maximumf %11, %12 : vector<16x128xf32>
    %14 = vector.extract_strided_slice %0 {offsets = [1, 0, 0], sizes = [1, 16, 16], strides = [1, 1, 1]} : vector<4x16x16xf32> to vector<1x16x16xf32>
    %15 = vector.shape_cast %14 : vector<1x16x16xf32> to vector<16x16xf32>
    %cst_9 = arith.constant dense<0.000000e+00> : vector<16x128xf32>
    %16 = tpu.matmul %15, %13, %cst_9 {dimension_numbers = #tpu.dot_dimension_numbers<[1], [0], [0], [1], [0, 0, 1, 1], [], []>, precision = #tpu.contract_precision<fp32>} : vector<16x16xf32>, vector<16x128xf32>, vector<16x128xf32> -> vector<16x128xf32>
    %17 = vector.extract_strided_slice %1 {offsets = [1, 0, 0], sizes = [1, 16, 1], strides = [1, 1, 1]} : vector<4x16x1xf32> to vector<1x16x1xf32>
    %18 = vector.shape_cast %17 : vector<1x16x1xf32> to vector<16x1xf32>
    %19 = vector.broadcast %18 : vector<16x1xf32> to vector<16x128xf32>
    %20 = arith.addf %16, %19 : vector<16x128xf32>
    %cst_10 = arith.constant 0.000000e+00 : f32
    %21 = vector.broadcast %cst_10 : f32 to vector<16x128xf32>
    %22 = arith.maximumf %20, %21 : vector<16x128xf32>
    %23 = vector.extract_strided_slice %0 {offsets = [2, 0, 0], sizes = [1, 16, 16], strides = [1, 1, 1]} : vector<4x16x16xf32> to vector<1x16x16xf32>
    %24 = vector.shape_cast %23 : vector<1x16x16xf32> to vector<16x16xf32>
    %cst_11 = arith.constant dense<0.000000e+00> : vector<16x128xf32>
    %25 = tpu.matmul %24, %22, %cst_11 {dimension_numbers = #tpu.dot_dimension_numbers<[1], [0], [0], [1], [0, 0, 1, 1], [], []>, precision = #tpu.contract_precision<fp32>} : vector<16x16xf32>, vector<16x128xf32>, vector<16x128xf32> -> vector<16x128xf32>
    %26 = vector.extract_strided_slice %1 {offsets = [2, 0, 0], sizes = [1, 16, 1], strides = [1, 1, 1]} : vector<4x16x1xf32> to vector<1x16x1xf32>
    %27 = vector.shape_cast %26 : vector<1x16x1xf32> to vector<16x1xf32>
    %28 = vector.broadcast %27 : vector<16x1xf32> to vector<16x128xf32>
    %29 = arith.addf %25, %28 : vector<16x128xf32>
    %cst_12 = arith.constant 0.000000e+00 : f32
    %30 = vector.broadcast %cst_12 : f32 to vector<16x128xf32>
    %31 = arith.maximumf %29, %30 : vector<16x128xf32>
    %32 = vector.extract_strided_slice %0 {offsets = [3, 0, 0], sizes = [1, 16, 16], strides = [1, 1, 1]} : vector<4x16x16xf32> to vector<1x16x16xf32>
    %33 = vector.shape_cast %32 : vector<1x16x16xf32> to vector<16x16xf32>
    %cst_13 = arith.constant dense<0.000000e+00> : vector<16x128xf32>
    %34 = tpu.matmul %33, %31, %cst_13 {dimension_numbers = #tpu.dot_dimension_numbers<[1], [0], [0], [1], [0, 0, 1, 1], [], []>, precision = #tpu.contract_precision<fp32>} : vector<16x16xf32>, vector<16x128xf32>, vector<16x128xf32> -> vector<16x128xf32>
    %35 = vector.extract_strided_slice %1 {offsets = [3, 0, 0], sizes = [1, 16, 1], strides = [1, 1, 1]} : vector<4x16x1xf32> to vector<1x16x1xf32>
    %36 = vector.shape_cast %35 : vector<1x16x1xf32> to vector<16x1xf32>
    %37 = vector.broadcast %36 : vector<16x1xf32> to vector<16x128xf32>
    %38 = arith.addf %34, %37 : vector<16x128xf32>
    %39 = vector.extract_strided_slice %38 {offsets = [0, 0], sizes = [8, 128], strides = [1, 1]} : vector<16x128xf32> to vector<8x128xf32>
    %c0_14 = arith.constant 0 : index
    %c0_15 = arith.constant 0 : index
    %40 = vector.load %arg4[%c0_14, %c0_15] : memref<8x128xf32, #tpu.memory_space<vmem>>, vector<8x128xf32>
    tpu.vector_store %arg4[%c0_14, %c0_15], %39 {strides = array<i32>} : memref<8x128xf32, #tpu.memory_space<vmem>>, vector<8x128xf32>,
    return
  }
  func.func @transform_0(%arg0: i32) -> (i32, i32) {
    %c0_i32 = arith.constant 0 : i32
    %c0_i32_0 = arith.constant 0 : i32
    return %c0_i32, %arg0 : i32, i32
  }
  func.func @transform_1(%arg0: i32) -> (i32, i32, i32) {
    %c0_i32 = arith.constant 0 : i32
    %c0_i32_0 = arith.constant 0 : i32
    %c0_i32_1 = arith.constant 0 : i32
    %c0_i32_2 = arith.constant 0 : i32
    return %c0_i32, %c0_i32_0, %c0_i32_1 : i32, i32, i32
  }
  func.func @transform_2(%arg0: i32) -> (i32, i32, i32) {
    %c0_i32 = arith.constant 0 : i32
    %c0_i32_0 = arith.constant 0 : i32
    %c0_i32_1 = arith.constant 0 : i32
    %c0_i32_2 = arith.constant 0 : i32
    return %c0_i32, %c0_i32_0, %c0_i32_1 : i32, i32, i32
  }
  func.func @transform_3(%arg0: i32) -> (i32, i32) {
    %c0_i32 = arith.constant 0 : i32
    %c0_i32_0 = arith.constant 0 : i32
    return %c0_i32, %arg0 : i32, i32
  }
}

</mosaic_0001>

<bundles_post_ra>
// kernel: model_v1_forward.1
= control target key start
LH: loop header
LB: loop body
LE: loop exit
PB: predicated region body
PF: predicated region fallthrough
CT: control target
= control target key end

     0   :  { %vm41_vm0 = vcmask 130048   ;;  %v2344_v3 = vmov 0   ;;  %s2487_s0 = inlined_call_operand.vmem [shape: f32[8,128], index: 0, kind: input, shape index: {}]   ;;  %s2488_s1 = inlined_call_operand.vmem [shape: f32[4,16,16], index: 1, kind: input, shape index: {}]   ;;  %s2489_s2 = inlined_call_operand.vmem [shape: f32[4,16,1], index: 2, kind: input, shape index: {}]   ;;  %s2490_s3 = inlined_call_operand.vmem [shape: f32[8,128], index: 3, kind: output, shape index: {}]  }
   0x1   :  { %v30_v0 = vld [vmem:[%s2487_s0] sm:$0xff]  ;;  %v15_v2 = vld [vmem:[%s2488_s1 + $0x8] sm:$0xff]  ;;  %2342 = vset.pattern.permute.xlu0 %v2344_v3  ;;  %2343 = vset.pattern.permute.xlu1 %v2344_v3  ;;  %v28_v24 = vld [vmem:[%s2489_s2 + $0x30] sm:$0xff] }
   0x2   :  { %v14_v1 = vld [vmem:[%s2488_s1] sm:$0xff]  ;;  %v79_v4 = vand.u32 4294901760, %v30_v0  ;;  %v46_v6 = vsel %vm41_vm0, %v15_v2, 0  ;;  %v23_v7 = vld [vmem:[%s2489_s2 + $0x8] sm:$0xff]  ;;  %v16_v25 = vld [vmem:[%s2488_s1 + $0x10] sm:$0xff] }
   0x3   :  { %v43_v5 = vsel %vm41_vm0, %v14_v1, 0  ;;  %v124_v9 = vand.u32 4294901760, %v46_v6  ;;  %38 = vperm.xlu0 %2342, %v23_v7   ;;  %v22_v11 = vld [vmem:[%s2489_s2] sm:$0xff]  ;;  %v27_v18 = vld [vmem:[%s2489_s2 + $0x28] sm:$0xff]  ;;  %v550_v26 = vsel %vm41_vm0, %v16_v25, 0  ;;  %v25_v32 = vld [vmem:[%s2489_s2 + $0x18] sm:$0xff] }
   0x4   :  { %v114_v8 = vand.u32 4294901760, %v43_v5  ;;  %2185 = vmatprep.subr.mxu0 %v79_v4  ;;  %v166_v10 = vsub.f32 %v30_v0, %v79_v4  ;;  %v2392_v27 = vand.u32 4294901760, %v550_v26  ;;  %546 = vperm.xlu1 %2343, %v25_v32   ;;  %v24_v33 = vld [vmem:[%s2489_s2 + $0x10] sm:$0xff]  ;;  %v26_v34 = vld [vmem:[%s2489_s2 + $0x20] sm:$0xff]  ;;  %v17_v36 = vld [vmem:[%s2488_s1 + $0x18] sm:$0xff] }
   0x5   :  { %2186 = vmatpush3.msra.mxu0 %v79_v4  ;;  %v125_v13 = vsub.f32 %v46_v6, %v124_v9  ;;  %v553_v37 = vsel %vm41_vm0, %v17_v36, 0  ;;  %v19_v25 = vld [vmem:[%s2488_s1 + $0x28] sm:$0xff] }
   0x6   :  { %v115_v12 = vsub.f32 %v43_v5, %v114_v8  ;;  %2192 = vmatprep.mubr.f32.mxu1 %v114_v8  ;;  %v167_v14 = vand.u32 4294901760, %v166_v10  ;;  %2195 = vmatprep.subr.mxu0 %v166_v10  ;;  %v2395_v28 = vsub.f32 %v550_v26, %v2392_v27  ;;  %v2415_v42 = vand.u32 4294901760, %v553_v37 }
   0x7   :  { %v126_v16 = vand.u32 4294901760, %v125_v13  ;;  %33 = vperm.xlu0 %2342, %v22_v11  }
   0x8   :  { %v116_v15 = vand.u32 4294901760, %v115_v12  ;;  %v168_v17 = vsub.f32 %v166_v10, %v167_v14  ;;  %v624_v29 = vand.u32 4294901760, %v2395_v28  ;;  %541 = vperm.xlu1 %2343, %v24_v33   ;;  %v633_v51 = vsub.f32 %v553_v37, %v2415_v42 }
   0x9   :  { %v127_v20 = vsub.f32 %v125_v13, %v126_v16 }
   0xa   :  { %v117_v19 = vsub.f32 %v115_v12, %v116_v15  ;;  %v169_v21 = vand.u32 4294901760, %v168_v17  ;;  %v625_v30 = vsub.f32 %v2395_v28, %v624_v29  ;;  %v634_v60 = vand.u32 4294901760, %v633_v51 }
   0xb   :  { %v128_v23 = vand.u32 4294901760, %v127_v20  ;;  %1066 = vperm.xlu0 %2342, %v27_v18  }
   0xc   :  { %v118_v22 = vand.u32 4294901760, %v117_v19  ;;  %2190 = vmatprep.subr.mxu1 %v169_v21  ;;  %v626_v31 = vand.u32 4294901760, %v625_v30  ;;  %1061 = vperm.xlu1 %2343, %v26_v34   ;;  %v635_v3 = vsub.f32 %v633_v51, %v634_v60 }
   0xd   :  { %2191 = vmatpush3.msra.mxu1 %v169_v21 }
   0xe   :  { %2187 = vmatprep.mubr.f32.mxu0 %v118_v22  ;;  %2193 = vmatmul.mubr.f32.vlgmr.msra.gmra.mxu1 %v124_v9 }
   0xf   :  { %2188 = vmatmul.mubr.f32.vlgmr.msra.gmra.mxu0 %v128_v23  ;;  %2200 = vmatprep.subr.mxu1 %v79_v4 }
  0x10   :  { %2196 = vmatpush3.msra.mxu0 %v166_v10  ;;  %2197 = vmatprep.mubr.f32.mxu0 %v115_v12 }
  0x11   :  { %2201 = vmatpush3.msra.mxu1 %v79_v4  ;;  %2202 = vmatprep.mubr.f32.mxu1 %v116_v15 }
  0x12   :  { %2205 = vmatprep.subr.mxu0 %v167_v14  ;;  %2203 = vmatmul.mubr.f32.vlgmr.msra.gmra.mxu1 %v126_v16  ;;  %v18_v16 = vld [vmem:[%s2488_s1 + $0x20] sm:$0xff] }
  0x13   :  { %2198 = vmatmul.mubr.f32.vlgmr.msra.gmra.mxu0 %v125_v13  ;;  %2210 = vmatprep.subr.mxu1 %v79_v4  ;;  %v1070_v17 = vsel %vm41_vm0, %v18_v16, 0 }
  0x14   :  { %2206 = vmatpush3.msra.mxu0 %v167_v14  ;;  %2207 = vmatprep.mubr.f32.mxu0 %v114_v8  ;;  %v2430_v18 = vand.u32 4294901760, %v1070_v17 }
  0x15   :  { %2211 = vmatpush3.msra.mxu1 %v79_v4  ;;  %2212 = vmatprep.mubr.f32.mxu1 %v114_v8  ;;  %v636_v8 = vand.u32 4294901760, %v635_v3 }
  0x16   :  { %1581 = vperm.xlu0 %2342, %v28_v24   ;;  %2213 = vmatmul.mubr.f32.vlgmr.msra.gmra.mxu1 %v124_v9  ;;  %v2433_v19 = vsub.f32 %v1070_v17, %v2430_v18 }
  0x17   :  { %2208 = vmatmul.mubr.f32.vlgmr.msra.gmra.mxu0 %v124_v9  ;;  %2226 = vmatprep.mubr.f32.mxu1 %v2392_v27 }
  0x18   :  { %2219 = vmatprep.mubr.f32.mxu0 %v626_v31  ;;  %v1144_v20 = vand.u32 4294901760, %v2433_v19 }
  0x1a   :  { %v1145_v21 = vsub.f32 %v2433_v19, %v1144_v20 }
  0x1c   :  { %v1146_v22 = vand.u32 4294901760, %v1145_v21 }
  0x7e   :  { %v39_v35 = vpop.permute.xlu0 %38 }
  0x7f   :  { %v547_v24 = vpop.permute.xlu1 %546 }
  0x82   :  { %v34_v40 = vpop.permute.xlu0 %33 }
  0x83   :  { %v542_v30 = vpop.permute.xlu1 %541 }
  0x86   :  { %v1067_v16 = vpop.permute.xlu0 %1066 }
  0xce   :  { %v2194_v39 = vpop.f32.mrf.mxu1 }
  0xcf   :  { %v2189_v38 = vpop.f32.mrf.mxu0 }
  0xd0   :  { %v131_v41 = vadd.f32 %v2189_v38, %v39_v35  ;;  %v206_v44 = vpop.f32.mrf.mxu1 }
  0xd1   :  { %v120_v43 = vpop.f32.mrf.mxu0 }
  0xd2   :  { %v213_v45 = vadd.f32 %v2194_v39, %v131_v41  ;;  %v121_v46 = vadd.f32 %v120_v43, %v34_v40  ;;  %v2204_v48 = vpop.f32.mrf.mxu1 }
  0xd3   :  { %v2199_v47 = vpop.f32.mrf.mxu0 }
  0xd4   :  { %v207_v49 = vadd.f32 %v206_v44, %v121_v46  ;;  %v294_v50 = vadd.f32 %v2199_v47, %v213_v45  ;;  %v367_v53 = vpop.f32.mrf.mxu1 }
  0xd5   :  { %v286_v52 = vpop.f32.mrf.mxu0 }
  0xd6   :  { %v376_v54 = vadd.f32 %v2204_v48, %v294_v50  ;;  %v287_v55 = vadd.f32 %v286_v52, %v207_v49  ;;  %v2214_v57 = vpop.f32.mrf.mxu1 }
  0xd7   :  { %v2209_v56 = vpop.f32.mrf.mxu0 }
  0xd8   :  { %v368_v58 = vadd.f32 %v367_v53, %v287_v55  ;;  %v456_v59 = vadd.f32 %v2209_v56, %v376_v54  ;;  %v527_v0 = vpop.f32.mrf.mxu1 }
  0xd9   :  { %v449_v61 = vpop.f32.mrf.mxu0 }
  0xda   :  { %v534_v62 = vadd.f32 %v2214_v57, %v456_v59  ;;  %v450_v63 = vadd.f32 %v449_v61, %v368_v58 }
  0xdc   :  { %v538_v1 = vmax.f32 %v534_v62, 0.0  ;;  %v528_v2 = vadd.f32 %v527_v0, %v450_v63 }
  0xde   :  { %v584_v4 = vand.u32 4294901760, %v538_v1  ;;  %v537_v5 = vmax.f32 %v528_v2, 0.0 }
  0xe0   :  { %v672_v6 = vsub.f32 %v538_v1, %v584_v4  ;;  %v587_v7 = vand.u32 4294901760, %v537_v5  ;;  %2215 = vmatprep.subr.mxu0 %v584_v4 }
  0xe1   :  { %2216 = vmatpush3.msra.mxu0 %v584_v4 }
  0xe2   :  { %v679_v9 = vsub.f32 %v537_v5, %v587_v7  ;;  %2217 = vmatprep.subr.mxu0 %v587_v7  ;;  %v673_v10 = vand.u32 4294901760, %v672_v6 }
  0xe3   :  { %2218 = vmatpush3.msra.mxu0 %v587_v7 }
  0xe4   :  { %2229 = vmatprep.subr.mxu0 %v672_v6  ;;  %2220 = vmatmul.mubr.f32.vlgmr.msra.gmra.mxu0 %v636_v8  ;;  %v674_v11 = vsub.f32 %v672_v6, %v673_v10  ;;  %v680_v12 = vand.u32 4294901760, %v679_v9 }
  0xe5   :  { %2230 = vmatpush3.msra.mxu0 %v672_v6  ;;  %2233 = vmatprep.mubr.f32.mxu0 %v2395_v28  ;;  %v1073_v28 = vsel %vm41_vm0, %v19_v25, 0 }
  0xe6   :  { %2231 = vmatprep.subr.mxu0 %v679_v9  ;;  %v675_v13 = vand.u32 4294901760, %v674_v11  ;;  %v681_v14 = vsub.f32 %v679_v9, %v680_v12  ;;  %v2444_v32 = vand.u32 4294901760, %v1073_v28 }
  0xe7   :  { %2232 = vmatpush3.msra.mxu0 %v679_v9 }
  0xe8   :  { %2222 = vmatprep.subr.mxu1 %v675_v13  ;;  %2243 = vmatprep.subr.mxu0 %v673_v10  ;;  %v682_v15 = vand.u32 4294901760, %v681_v14  ;;  %v1153_v39 = vsub.f32 %v1073_v28, %v2444_v32 }
  0xe9   :  { %2223 = vmatpush3.msra.mxu1 %v675_v13  ;;  %2234 = vmatmul.mubr.f32.vlgmr.msra.gmra.mxu0 %v633_v51 }
  0xea   :  { %2244 = vmatpush3.msra.mxu0 %v673_v10  ;;  %2224 = vmatprep.subr.mxu1 %v682_v15  ;;  %v1154_v47 = vand.u32 4294901760, %v1153_v39 }
  0xeb   :  { %2245 = vmatprep.subr.mxu0 %v680_v12  ;;  %2225 = vmatpush3.msra.mxu1 %v682_v15 }
  0xec   :  { %2246 = vmatpush3.msra.mxu0 %v680_v12  ;;  %2227 = vmatmul.mubr.f32.vlgmr.msra.gmra.mxu1 %v2415_v42  ;;  %v1155_v55 = vsub.f32 %v1153_v39, %v1154_v47  ;;  %v21_v12 = vld [vmem:[%s2488_s1 + $0x38] sm:$0xff] }
  0xed   :  { %2236 = vmatprep.subr.mxu1 %v584_v4  ;;  %2240 = vmatprep.mubr.f32.mxu1 %v624_v29  ;;  %v1592_v15 = vsel %vm41_vm0, %v21_v12, 0 }
  0xee   :  { %2237 = vmatpush3.msra.mxu1 %v584_v4  ;;  %2247 = vmatprep.mubr.f32.mxu0 %v2392_v27 }
  0xef   :  { %2238 = vmatprep.subr.mxu1 %v587_v7  ;;  %2248 = vmatmul.mubr.f32.vlgmr.msra.gmra.mxu0 %v2415_v42 }
  0xf0   :  { %2239 = vmatpush3.msra.mxu1 %v587_v7  ;;  %2261 = vmatprep.mubr.f32.mxu0 %v1146_v22 }
  0xf1   :  { %2241 = vmatmul.mubr.f32.vlgmr.msra.gmra.mxu1 %v634_v60  ;;  %2250 = vmatprep.subr.mxu1 %v584_v4  ;;  %v1156_v60 = vand.u32 4294901760, %v1155_v55 }
  0xf2   :  { %2251 = vmatpush3.msra.mxu1 %v584_v4  ;;  %2254 = vmatprep.mubr.f32.mxu1 %v2392_v27  ;;  %v20_v4 = vld [vmem:[%s2488_s1 + $0x30] sm:$0xff] }
  0xf3   :  { %2252 = vmatprep.subr.mxu1 %v587_v7  ;;  %v1589_v5 = vsel %vm41_vm0, %v20_v4, 0 }
  0xf4   :  { %2253 = vmatpush3.msra.mxu1 %v587_v7  ;;  %v2459_v6 = vand.u32 4294901760, %v1589_v5 }
  0xf5   :  { %2255 = vmatmul.mubr.f32.vlgmr.msra.gmra.mxu1 %v2415_v42 }
  0xf6   :  { %2268 = vmatprep.mubr.f32.mxu1 %v2430_v18  ;;  %v2462_v7 = vsub.f32 %v1589_v5, %v2459_v6 }
  0xf8   :  { %v1663_v8 = vand.u32 4294901760, %v2462_v7 }
  0xfa   :  { %v1664_v9 = vsub.f32 %v2462_v7, %v1663_v8 }
  0xfc   :  { %v1665_v10 = vand.u32 4294901760, %v1664_v9 }
 0x1a4   :  { %v2221_v23 = vpop.f32.mrf.mxu0 }
 0x1a5   :  { %v639_v29 = vadd.f32 %v2221_v23, %v547_v24 }
 0x1a6   :  { %v628_v26 = vpop.f32.mrf.mxu0 }
 0x1a7   :  { %v629_v33 = vadd.f32 %v628_v26, %v542_v30 }
 0x1a9   :  { %v2235_v27 = vpop.f32.mrf.mxu0 }
 0x1ab   :  { %v801_v35 = vpop.f32.mrf.mxu0 }
 0x1ac   :  { %v2228_v31 = vpop.f32.mrf.mxu1 }
 0x1ad   :  { %v726_v34 = vadd.f32 %v2228_v31, %v639_v29 }
 0x1ae   :  { %v719_v36 = vpop.f32.mrf.mxu1 }
 0x1af   :  { %v809_v37 = vadd.f32 %v2235_v27, %v726_v34  ;;  %v720_v38 = vadd.f32 %v719_v36, %v629_v33  ;;  %v2249_v42 = vpop.f32.mrf.mxu0 }
 0x1b1   :  { %v802_v40 = vadd.f32 %v801_v35, %v720_v38  ;;  %v2242_v41 = vpop.f32.mrf.mxu1  ;;  %v968_v48 = vpop.f32.mrf.mxu0 }
 0x1b2   :  { %v892_v43 = vadd.f32 %v2242_v41, %v809_v37 }
 0x1b3   :  { %v883_v44 = vpop.f32.mrf.mxu1 }
 0x1b4   :  { %v975_v45 = vadd.f32 %v2249_v42, %v892_v43  ;;  %v884_v46 = vadd.f32 %v883_v44, %v802_v40 }
 0x1b5   :  { %v2256_v49 = vpop.f32.mrf.mxu1 }
 0x1b6   :  { %v969_v50 = vadd.f32 %v968_v48, %v884_v46  ;;  %v1054_v51 = vadd.f32 %v2256_v49, %v975_v45 }
 0x1b7   :  { %v1047_v52 = vpop.f32.mrf.mxu1 }
 0x1b8   :  { %v1058_v53 = vmax.f32 %v1054_v51, 0.0  ;;  %v1048_v54 = vadd.f32 %v1047_v52, %v969_v50 }
 0x1ba   :  { %v1104_v56 = vand.u32 4294901760, %v1058_v53  ;;  %v1057_v57 = vmax.f32 %v1048_v54, 0.0 }
 0x1bc   :  { %v1192_v58 = vsub.f32 %v1058_v53, %v1104_v56  ;;  %v1107_v59 = vand.u32 4294901760, %v1057_v57  ;;  %2257 = vmatprep.subr.mxu0 %v1104_v56 }
 0x1bd   :  { %2258 = vmatpush3.msra.mxu0 %v1104_v56 }
 0x1be   :  { %v1199_v61 = vsub.f32 %v1057_v57, %v1107_v59  ;;  %2259 = vmatprep.subr.mxu0 %v1107_v59  ;;  %v1193_v62 = vand.u32 4294901760, %v1192_v58 }
 0x1bf   :  { %2260 = vmatpush3.msra.mxu0 %v1107_v59 }
 0x1c0   :  { %2262 = vmatmul.mubr.f32.vlgmr.msra.gmra.mxu0 %v1156_v60  ;;  %2271 = vmatprep.subr.mxu0 %v1192_v58  ;;  %v1194_v63 = vsub.f32 %v1192_v58, %v1193_v62  ;;  %v1200_v0 = vand.u32 4294901760, %v1199_v61  ;;  %v1582_v60 = vpop.permute.xlu0 %1581 }
 0x1c1   :  { %2272 = vmatpush3.msra.mxu0 %v1192_v58  ;;  %2275 = vmatprep.mubr.f32.mxu0 %v2433_v19 }
 0x1c2   :  { %2273 = vmatprep.subr.mxu0 %v1199_v61  ;;  %v1195_v1 = vand.u32 4294901760, %v1194_v63  ;;  %v1201_v2 = vsub.f32 %v1199_v61, %v1200_v0 }
 0x1c3   :  { %2274 = vmatpush3.msra.mxu0 %v1199_v61 }
 0x1c4   :  { %2264 = vmatprep.subr.mxu1 %v1195_v1  ;;  %2285 = vmatprep.subr.mxu0 %v1193_v62  ;;  %v1202_v3 = vand.u32 4294901760, %v1201_v2 }
 0x1c5   :  { %2265 = vmatpush3.msra.mxu1 %v1195_v1  ;;  %2276 = vmatmul.mubr.f32.vlgmr.msra.gmra.mxu0 %v1153_v39 }
 0x1c6   :  { %2286 = vmatpush3.msra.mxu0 %v1193_v62  ;;  %2266 = vmatprep.subr.mxu1 %v1202_v3 }
 0x1c7   :  { %2287 = vmatprep.subr.mxu0 %v1200_v0  ;;  %2267 = vmatpush3.msra.mxu1 %v1202_v3 }
 0x1c8   :  { %2288 = vmatpush3.msra.mxu0 %v1200_v0  ;;  %2269 = vmatmul.mubr.f32.vlgmr.msra.gmra.mxu1 %v2444_v32 }
 0x1c9   :  { %2278 = vmatprep.subr.mxu1 %v1104_v56  ;;  %2282 = vmatprep.mubr.f32.mxu1 %v1144_v20  ;;  %v2473_v20 = vand.u32 4294901760, %v1592_v15 }
 0x1ca   :  { %2279 = vmatpush3.msra.mxu1 %v1104_v56  ;;  %2289 = vmatprep.mubr.f32.mxu0 %v2430_v18 }
 0x1cb   :  { %2280 = vmatprep.subr.mxu1 %v1107_v59  ;;  %2290 = vmatmul.mubr.f32.vlgmr.msra.gmra.mxu0 %v2444_v32  ;;  %v1672_v27 = vsub.f32 %v1592_v15, %v2473_v20 }
 0x1cc   :  { %2281 = vmatpush3.msra.mxu1 %v1107_v59  ;;  %2303 = vmatprep.mubr.f32.mxu0 %v1665_v10 }
 0x1cd   :  { %2283 = vmatmul.mubr.f32.vlgmr.msra.gmra.mxu1 %v1154_v47  ;;  %2292 = vmatprep.subr.mxu1 %v1104_v56  ;;  %v1673_v35 = vand.u32 4294901760, %v1672_v27 }
 0x1ce   :  { %2293 = vmatpush3.msra.mxu1 %v1104_v56  ;;  %2296 = vmatprep.mubr.f32.mxu1 %v2430_v18  ;;  %v1062_v18 = vpop.permute.xlu1 %1061 }
 0x1cf   :  { %2294 = vmatprep.subr.mxu1 %v1107_v59  ;;  %v1674_v43 = vsub.f32 %v1672_v27, %v1673_v35 }
 0x1d0   :  { %2295 = vmatpush3.msra.mxu1 %v1107_v59 }
 0x1d1   :  { %2297 = vmatmul.mubr.f32.vlgmr.msra.gmra.mxu1 %v2444_v32  ;;  %v1675_v48 = vand.u32 4294901760, %v1674_v43 }
 0x1d2   :  { %2310 = vmatprep.mubr.f32.mxu1 %v2459_v6 }
 0x280   :  { %v2263_v11 = vpop.f32.mrf.mxu0 }
 0x281   :  { %v1159_v17 = vadd.f32 %v2263_v11, %v1067_v16 }
 0x282   :  { %v1148_v13 = vpop.f32.mrf.mxu0 }
 0x283   :  { %v1149_v21 = vadd.f32 %v1148_v13, %v1062_v18 }
 0x285   :  { %v2277_v14 = vpop.f32.mrf.mxu0 }
 0x287   :  { %v1321_v23 = vpop.f32.mrf.mxu0 }
 0x288   :  { %v2270_v19 = vpop.f32.mrf.mxu1 }
 0x289   :  { %v1246_v22 = vadd.f32 %v2270_v19, %v1159_v17 }
 0x28a   :  { %v1239_v24 = vpop.f32.mrf.mxu1 }
 0x28b   :  { %v1329_v25 = vadd.f32 %v2277_v14, %v1246_v22  ;;  %v1240_v26 = vadd.f32 %v1239_v24, %v1149_v21  ;;  %v2291_v30 = vpop.f32.mrf.mxu0 }
 0x28d   :  { %v1322_v28 = vadd.f32 %v1321_v23, %v1240_v26  ;;  %v2284_v29 = vpop.f32.mrf.mxu1  ;;  %v1488_v36 = vpop.f32.mrf.mxu0 }
 0x28e   :  { %v1412_v31 = vadd.f32 %v2284_v29, %v1329_v25 }
 0x28f   :  { %v1403_v32 = vpop.f32.mrf.mxu1 }
 0x290   :  { %v1495_v33 = vadd.f32 %v2291_v30, %v1412_v31  ;;  %v1404_v34 = vadd.f32 %v1403_v32, %v1322_v28 }
 0x291   :  { %v2298_v37 = vpop.f32.mrf.mxu1 }
 0x292   :  { %v1489_v38 = vadd.f32 %v1488_v36, %v1404_v34  ;;  %v1574_v39 = vadd.f32 %v2298_v37, %v1495_v33 }
 0x293   :  { %v1567_v40 = vpop.f32.mrf.mxu1 }
 0x294   :  { %v1578_v41 = vmax.f32 %v1574_v39, 0.0  ;;  %v1568_v42 = vadd.f32 %v1567_v40, %v1489_v38 }
 0x296   :  { %v1623_v44 = vand.u32 4294901760, %v1578_v41  ;;  %v1577_v45 = vmax.f32 %v1568_v42, 0.0 }
 0x298   :  { %v1710_v46 = vsub.f32 %v1578_v41, %v1623_v44  ;;  %v1626_v47 = vand.u32 4294901760, %v1577_v45  ;;  %2299 = vmatprep.subr.mxu0 %v1623_v44 }
 0x299   :  { %2300 = vmatpush3.msra.mxu0 %v1623_v44 }
 0x29a   :  { %v1717_v49 = vsub.f32 %v1577_v45, %v1626_v47  ;;  %2301 = vmatprep.subr.mxu0 %v1626_v47  ;;  %v1711_v50 = vand.u32 4294901760, %v1710_v46 }
 0x29b   :  { %2302 = vmatpush3.msra.mxu0 %v1626_v47 }
 0x29c   :  { %2304 = vmatmul.mubr.f32.vlgmr.msra.gmra.mxu0 %v1675_v48  ;;  %2313 = vmatprep.subr.mxu0 %v1710_v46  ;;  %v1712_v51 = vsub.f32 %v1710_v46, %v1711_v50  ;;  %v1718_v52 = vand.u32 4294901760, %v1717_v49 }
 0x29d   :  { %2314 = vmatpush3.msra.mxu0 %v1710_v46  ;;  %2317 = vmatprep.mubr.f32.mxu0 %v2462_v7 }
 0x29e   :  { %2315 = vmatprep.subr.mxu0 %v1717_v49  ;;  %v1713_v53 = vand.u32 4294901760, %v1712_v51  ;;  %v1719_v54 = vsub.f32 %v1717_v49, %v1718_v52 }
 0x29f   :  { %2316 = vmatpush3.msra.mxu0 %v1717_v49 }
 0x2a0   :  { %2306 = vmatprep.subr.mxu1 %v1713_v53  ;;  %2327 = vmatprep.subr.mxu0 %v1711_v50  ;;  %v1720_v55 = vand.u32 4294901760, %v1719_v54 }
 0x2a1   :  { %2307 = vmatpush3.msra.mxu1 %v1713_v53  ;;  %2318 = vmatmul.mubr.f32.vlgmr.msra.gmra.mxu0 %v1672_v27 }
 0x2a2   :  { %2328 = vmatpush3.msra.mxu0 %v1711_v50  ;;  %2308 = vmatprep.subr.mxu1 %v1720_v55 }
 0x2a3   :  { %2329 = vmatprep.subr.mxu0 %v1718_v52  ;;  %2309 = vmatpush3.msra.mxu1 %v1720_v55 }
 0x2a4   :  { %2330 = vmatpush3.msra.mxu0 %v1718_v52  ;;  %2311 = vmatmul.mubr.f32.vlgmr.msra.gmra.mxu1 %v2473_v20 }
 0x2a5   :  { %2320 = vmatprep.subr.mxu1 %v1623_v44  ;;  %2324 = vmatprep.mubr.f32.mxu1 %v1663_v8 }
 0x2a6   :  { %2321 = vmatpush3.msra.mxu1 %v1623_v44  ;;  %2331 = vmatprep.mubr.f32.mxu0 %v2459_v6 }
 0x2a7   :  { %2322 = vmatprep.subr.mxu1 %v1626_v47  ;;  %2332 = vmatmul.mubr.f32.vlgmr.msra.gmra.mxu0 %v2473_v20 }
 0x2a8   :  { %2323 = vmatpush3.msra.mxu1 %v1626_v47 }
 0x2a9   :  { %2325 = vmatmul.mubr.f32.vlgmr.msra.gmra.mxu1 %v1673_v35  ;;  %2334 = vmatprep.subr.mxu1 %v1623_v44 }
 0x2aa   :  { %2335 = vmatpush3.msra.mxu1 %v1623_v44  ;;  %2338 = vmatprep.mubr.f32.mxu1 %v2459_v6 }
 0x2ab   :  { %2336 = vmatprep.subr.mxu1 %v1626_v47 }
 0x2ac   :  { %2337 = vmatpush3.msra.mxu1 %v1626_v47 }
 0x2ad   :  { %2339 = vmatmul.mubr.f32.vlgmr.msra.gmra.mxu1 %v2473_v20 }
 0x35c   :  { %v2305_v56 = vpop.f32.mrf.mxu0 }
 0x35e   :  { %v1667_v57 = vpop.f32.mrf.mxu0 }
 0x35f   :  { %v1668_v62 = vadd.f32 %v1667_v57, %v1582_v60 }
 0x361   :  { %v2319_v58 = vpop.f32.mrf.mxu0 }
 0x363   :  { %v1838_v59 = vpop.f32.mrf.mxu0 }
 0x364   :  { %v2312_v61 = vpop.f32.mrf.mxu1 }
 0x366   :  { %v1757_v63 = vpop.f32.mrf.mxu1 }
 0x367   :  { %v1758_v0 = vadd.f32 %v1757_v63, %v1668_v62  ;;  %v2333_v1 = vpop.f32.mrf.mxu0 }
 0x369   :  { %v1839_v2 = vadd.f32 %v1838_v59, %v1758_v0  ;;  %v2326_v3 = vpop.f32.mrf.mxu1  ;;  %v2003_v7 = vpop.f32.mrf.mxu0 }
 0x36b   :  { %v1919_v4 = vpop.f32.mrf.mxu1 }
 0x36c   :  { %v1920_v5 = vadd.f32 %v1919_v4, %v1839_v2 }
 0x36d   :  { %v2340_v6 = vpop.f32.mrf.mxu1 }
 0x36e   :  { %v2004_v8 = vadd.f32 %v2003_v7, %v1920_v5 }
 0x36f   :  { %v2081_v9 = vpop.f32.mrf.mxu1 }
 0x370   :  { %v2082_v10 = vadd.f32 %v2081_v9, %v2004_v8 }
 0x372   :  { %2090 = vst [vmem:[%s2490_s3] sm:$0xff] %v2082_v10 }

</bundles_post_ra>
